<compile_context>
chip_gen: v7x
topology: tpu7x:2x2x1
jax: 0.10.0
libtpu: 0.0.40
codegen_flags: <defaults>
</compile_context>

<pallas_src>
import jax
import jax.numpy as jnp
import numpy as np
from jax import lax
from jax.experimental import pallas as pl
from jax.experimental.pallas import tpu as pltpu

_TOKENS_PER_ROW = 128          # tokens packed per reshaped row (lane dense)
_BLOCK_ROWS = 64               # 64 rows * 128 tokens = 8192 tokens per grid step
_INF_BITS_P1 = 0x7F800001      # one past the bit pattern of +inf (f32)


def _sum11(x):
    """Full reduction of a 2-D array to shape (1, 1): lanes first, then sublanes."""
    return jnp.sum(jnp.sum(x, axis=1, keepdims=True), axis=0, keepdims=True)


def _focal_loss_kernel(e_ref, cls_ref, probs_ref, labels_ref, out_ref,
                       negc_ref, tis_ref, npos_ref, nneg_ref):
    i = pl.program_id(0)
    n_tiles = pl.num_programs(0)
    blk_rows = labels_ref.shape[0]

    @pl.when(i == 0)
    def _init():
        tis_ref[...] = jnp.zeros_like(tis_ref)
        npos_ref[...] = jnp.zeros_like(npos_ref)
        nneg_ref[...] = jnp.zeros_like(nneg_ref)

    lab = labels_ref[...]                                     # (blk_rows, 128) i32
    probs = probs_ref[...]                                    # (blk_rows, 128*C) f32

    # Broadcast each token's label to its C consecutive lanes.  E is a constant
    # 0/1 matrix with exactly one 1 per column, labels are small ints -> the
    # matmul is exact, and the MXU is otherwise idle in this kernel.
    lab_w = jnp.dot(lab.astype(jnp.float32), e_ref[...],
                    preferred_element_type=jnp.float32)       # (blk_rows, 128*C)
    mask = lab_w == cls_ref[...]                              # selected class lane
    cost_w = jnp.where(mask, -jnp.log(probs), 0.0)            # cost only at selected lane

    # type-I contribution + exact int32 counts.
    tis_ref[...] += _sum11(jnp.where(lab_w > 0.5, cost_w, 0.0))
    npos_ref[...] += _sum11((lab > 0).astype(jnp.int32))
    nneg_ref[...] += _sum11((lab == 0).astype(jnp.int32))

    # type-II costs, kept dense in VMEM; sentinel -1.0 < every real cost (>= 0).
    row0 = pl.multiple_of(i * blk_rows, blk_rows)
    negc_ref[pl.ds(row0, blk_rows), :] = jnp.where(
        mask & (lab_w == 0.0), cost_w, -1.0)

    @pl.when(i == n_tiles - 1)
    def _finalize():
        npos = npos_ref[...]                                  # (1,1) i32
        nneg = nneg_ref[...]
        half_n = jnp.right_shift(npos, 1)
        k = jnp.minimum(2 * npos + half_n, nneg)              # int(2.5*N), [:k] clips
        denom = (3 * npos + half_n).astype(jnp.float32)       # int(3.5*N)

        # Exact k-th largest type-II cost via bisection on the (monotone for
        # non-negative floats) uint32 bit pattern of the threshold.
        lo0 = jnp.zeros((1, 1), jnp.int32)                    # bits of +0.0
        hi0 = jnp.full((1, 1), _INF_BITS_P1, jnp.int32)       # count(>= NaN) == 0 < k

        def body(_, carry):
            lo, hi = carry
            mid = lo + jnp.right_shift(hi - lo, 1)
            t = pltpu.bitcast(mid, jnp.float32)
            cnt = _sum11((negc_ref[...] >= t).astype(jnp.int32))
            take = cnt >= k
            return jnp.where(take, mid, lo), jnp.where(take, hi, mid)

        lo, _ = lax.fori_loop(0, 32, body, (lo0, hi0))
        t = pltpu.bitcast(lo, jnp.float32)                    # k-th largest cost
        neg = negc_ref[...]
        ge = neg >= t
        cnt_ge = _sum11(ge.astype(jnp.int32))
        sum_ge = _sum11(jnp.where(ge, neg, 0.0))
        surplus = (cnt_ge - k).astype(jnp.float32)            # tied-at-threshold extras
        topk = sum_ge - jnp.where(surplus > 0, surplus * t, 0.0)
        topk = jnp.where(k > 0, topk, 0.0)

        # NOTE: N == 0 -> denom == 0 -> inf/nan, same behaviour as the torch code.
        out_ref[...] = (tis_ref[...] + topk) / denom


@jax.jit
def multiclass_focal_loss(outputs, labels):
    """outputs: (M, C) per-token class probabilities; labels: (M,) int class ids."""
    outputs = jnp.asarray(outputs, jnp.float32)
    labels = jnp.asarray(labels, jnp.int32).reshape(-1)
    M, C = outputs.shape
    if _TOKENS_PER_ROW % C != 0:
        raise NotImplementedError("number of classes must divide 128")
    W = _TOKENS_PER_ROW * C

    rows = pl.cdiv(M, _TOKENS_PER_ROW)
    if rows <= _BLOCK_ROWS:
        block_rows, rows_pad = rows, rows
    else:
        block_rows = _BLOCK_ROWS
        rows_pad = pl.cdiv(rows, block_rows) * block_rows
    m_pad = rows_pad * _TOKENS_PER_ROW
    if m_pad != M:
        # neutral padding: prob 1.0 (-log = 0) and label -1 (neither type-I nor II)
        outputs = jnp.pad(outputs, ((0, m_pad - M), (0, 0)), constant_values=1.0)
        labels = jnp.pad(labels, (0, m_pad - M), constant_values=-1)

    probs_w = outputs.reshape(rows_pad, W)                 # free contiguous reshapes
    labels_w = labels.reshape(rows_pad, _TOKENS_PER_ROW)

    # Constant helpers (trace-time constants).
    lane = np.arange(W)
    e = (lane[None, :] // C ==
         np.arange(_TOKENS_PER_ROW)[:, None]).astype(np.float32)   # (128, W) 0/1
    cls = (lane % C).astype(np.float32)[None, :]                   # (1, W) class-of-lane

    negc_bytes = rows_pad * W * 4
    vmem_limit = max(
        32 * 1024 * 1024,
        negc_bytes + 2 * block_rows * (W + _TOKENS_PER_ROW) * 4
        + e.size * 4 + (4 << 20))

    out = pl.pallas_call(
        _focal_loss_kernel,
        out_shape=jax.ShapeDtypeStruct((1, 1), jnp.float32),
        grid_spec=pltpu.PrefetchScalarGridSpec(
            num_scalar_prefetch=0,
            grid=(rows_pad // block_rows,),
            in_specs=[
                pl.BlockSpec((_TOKENS_PER_ROW, W), lambda i: (0, 0)),          # E
                pl.BlockSpec((1, W), lambda i: (0, 0)),                        # class ids
                pl.BlockSpec((block_rows, W), lambda i: (i, 0)),               # probs
                pl.BlockSpec((block_rows, _TOKENS_PER_ROW), lambda i: (i, 0)),  # labels
            ],
            out_specs=pl.BlockSpec((1, 1), lambda i: (0, 0)),
            scratch_shapes=[
                pltpu.VMEM((rows_pad, W), jnp.float32),   # type-II costs (sentinel -1)
                pltpu.VMEM((1, 1), jnp.float32),          # sum(type_i)
                pltpu.VMEM((1, 1), jnp.int32),            # N  = #(labels > 0)
                pltpu.VMEM((1, 1), jnp.int32),            # #(labels == 0)
            ]),
        compiler_params=pltpu.CompilerParams(
            # the final top-k bisection needs the whole type-II scratch on one
            # core, so the token axis stays sequential.
            dimension_semantics=("arbitrary",),
            vmem_limit_bytes=int(vmem_limit),
        ),
    )(jnp.asarray(e), jnp.asarray(cls), probs_w, labels_w)
    return out[0, 0]


class MulticlassFocalLoss:
    """Forward-only JAX/Pallas replacement for the PyTorch Multiclass_Focal_Loss."""

    def __init__(self, alpha=2):
        self.alpha = alpha  # unused by the reference forward; kept for parity

    def __call__(self, outputs, labels):
        return multiclass_focal_loss(outputs, labels)


Multiclass_Focal_Loss = MulticlassFocalLoss


if __name__ == "__main__":
    # 8 sentences x 128 tokens, 4 entity classes {O, Place, Person, Organisation};
    # ~10% of tokens are entities so the top-int(2.5N) truncation path is exercised.
    B, S, C = 8, 128, 4
    M = B * S
    key = jax.random.PRNGKey(0)
    k1, k2, k3 = jax.random.split(key, 3)
    logits = jax.random.normal(k1, (M, C), dtype=jnp.float32)
    outputs = jax.nn.softmax(logits, axis=-1)           # per-token class probabilities
    ent = jax.random.randint(k2, (M,), 1, C, dtype=jnp.int32)
    labels = jnp.where(jax.random.uniform(k3, (M,)) < 0.1, ent, 0)
    labels = labels.at[0].set(1).at[1].set(0)           # ensure both kinds exist

    loss_fn = MulticlassFocalLoss(alpha=2)
    loss = jax.block_until_ready(loss_fn(outputs, labels))

    # pure-numpy reference of the PyTorch forward
    o = np.asarray(outputs, np.float64)
    l = np.asarray(labels)
    costs = -np.log(o[np.arange(M), l])
    ti = costs[l > 0]
    tii = np.sort(costs[l == 0])[::-1][: int(2.5 * len(ti))]
    ref = (ti.sum() + tii.sum()) / int(3.5 * len(ti))
    assert np.allclose(float(loss), ref, rtol=1e-4, atol=1e-5), (float(loss), ref)

    print("KERNEL_OK")
</pallas_src>

<mosaic_0001>
module attributes {stable_mosaic.version = 11 : i64} {
  func.func @_focal_loss_kernel(%arg0: i32, %arg1: memref<128x512xf32, #tpu.memory_space<vmem>>, %arg2: memref<1x512xf32, #tpu.memory_space<vmem>>, %arg3: memref<8x512xf32, #tpu.memory_space<vmem>>, %arg4: memref<8x128xi32, #tpu.memory_space<vmem>>, %arg5: memref<1x1xf32, #tpu.memory_space<vmem>>, %arg6: memref<8x512xf32, #tpu.memory_space<vmem>>, %arg7: memref<1x1xf32, #tpu.memory_space<vmem>>, %arg8: memref<1x1xi32, #tpu.memory_space<vmem>>, %arg9: memref<1x1xi32, #tpu.memory_space<vmem>>) attributes {dimension_semantics = [#tpu.dimension_semantics<arbitrary>], iteration_bounds = array<i64: 1>, scalar_prefetch = 0 : i64, scratch_operands = 4 : i64, tpu.core_type = #tpu.core_type<tc>, window_params = [{pipeline_mode = #tpu.pipeline_mode<synchronous>, transform_indices = @transform_0, window_bounds = array<i64: 128, 512>}, {pipeline_mode = #tpu.pipeline_mode<synchronous>, transform_indices = @transform_1, window_bounds = array<i64: 1, 512>}, {transform_indices = @transform_2, window_bounds = array<i64: 8, 512>}, {transform_indices = @transform_3, window_bounds = array<i64: 8, 128>}, {pipeline_mode = #tpu.pipeline_mode<synchronous>, transform_indices = @transform_4, window_bounds = array<i64: 1, 1>}]} {
    %c0_i32 = arith.constant 0 : i32
    %0 = arith.cmpi eq, %arg0, %c0_i32 : i32
    %1 = arith.extui %0 : i1 to i32
    %c0_i32_0 = arith.constant 0 : i32
    %2 = arith.cmpi ne, %1, %c0_i32_0 : i32
    scf.if %2 {
      %cst_37 = arith.constant 0.000000e+00 : f32
      %59 = vector.broadcast %cst_37 : f32 to vector<1x1xf32>
      %c0_38 = arith.constant 0 : index
      %c0_39 = arith.constant 0 : index
      %60 = vector.load %arg7[%c0_38, %c0_39] : memref<1x1xf32, #tpu.memory_space<vmem>>, vector<1x1xf32>
      tpu.vector_store %arg7[%c0_38, %c0_39], %59 {strides = array<i32>} : memref<1x1xf32, #tpu.memory_space<vmem>>, vector<1x1xf32>,
      %c0_i32_40 = arith.constant 0 : i32
      %61 = vector.broadcast %c0_i32_40 : i32 to vector<1x1xi32>
      %c0_41 = arith.constant 0 : index
      %c0_42 = arith.constant 0 : index
      %62 = vector.load %arg8[%c0_41, %c0_42] : memref<1x1xi32, #tpu.memory_space<vmem>>, vector<1x1xi32>
      tpu.vector_store %arg8[%c0_41, %c0_42], %61 {strides = array<i32>} : memref<1x1xi32, #tpu.memory_space<vmem>>, vector<1x1xi32>,
      %c0_i32_43 = arith.constant 0 : i32
      %63 = vector.broadcast %c0_i32_43 : i32 to vector<1x1xi32>
      %c0_44 = arith.constant 0 : index
      %c0_45 = arith.constant 0 : index
      %64 = vector.load %arg9[%c0_44, %c0_45] : memref<1x1xi32, #tpu.memory_space<vmem>>, vector<1x1xi32>
      tpu.vector_store %arg9[%c0_44, %c0_45], %63 {strides = array<i32>} : memref<1x1xi32, #tpu.memory_space<vmem>>, vector<1x1xi32>,
    } else {
    }
    %c0 = arith.constant 0 : index
    %c0_1 = arith.constant 0 : index
    %3 = vector.load %arg4[%c0, %c0_1] : memref<8x128xi32, #tpu.memory_space<vmem>>, vector<8x128xi32>
    %c0_2 = arith.constant 0 : index
    %c0_3 = arith.constant 0 : index
    %4 = vector.load %arg3[%c0_2, %c0_3] : memref<8x512xf32, #tpu.memory_space<vmem>>, vector<8x512xf32>
    %5 = arith.sitofp %3 : vector<8x128xi32> to vector<8x128xf32>
    %c0_4 = arith.constant 0 : index
    %c0_5 = arith.constant 0 : index
    %6 = vector.load %arg1[%c0_4, %c0_5] : memref<128x512xf32, #tpu.memory_space<vmem>>, vector<128x512xf32>
    %cst = arith.constant dense<0.000000e+00> : vector<8x512xf32>
    %7 = tpu.matmul %5, %6, %cst {dimension_numbers = #tpu.dot_dimension_numbers<[1], [0], [0], [1], [0, 0, 1, 1], [], []>} : vector<8x128xf32>, vector<128x512xf32>, vector<8x512xf32> -> vector<8x512xf32>
    %c0_6 = arith.constant 0 : index
    %c0_7 = arith.constant 0 : index
    %8 = vector.load %arg2[%c0_6, %c0_7] : memref<1x512xf32, #tpu.memory_space<vmem>>, vector<1x512xf32>
    %9 = vector.broadcast %8 : vector<1x512xf32> to vector<8x512xf32>
    %10 = arith.cmpf oeq, %7, %9 : vector<8x512xf32>
    %11 = math.log %4 : vector<8x512xf32>
    %cst_8 = arith.constant 0.000000e+00 : f32
    %12 = vector.broadcast %cst_8 : f32 to vector<8x512xf32>
    %13 = arith.subf %12, %11 : vector<8x512xf32>
    %cst_9 = arith.constant 0.000000e+00 : f32
    %14 = vector.broadcast %cst_9 : f32 to vector<8x512xf32>
    %15 = arith.select %10, %13, %14 : vector<8x512xi1>, vector<8x512xf32>
    %c0_10 = arith.constant 0 : index
    %c0_11 = arith.constant 0 : index
    %16 = vector.load %arg7[%c0_10, %c0_11] : memref<1x1xf32, #tpu.memory_space<vmem>>, vector<1x1xf32>
    %cst_12 = arith.constant 5.000000e-01 : f32
    %17 = vector.broadcast %cst_12 : f32 to vector<8x512xf32>
    %18 = arith.cmpf ogt, %7, %17 : vector<8x512xf32>
    %cst_13 = arith.constant 0.000000e+00 : f32
    %19 = vector.broadcast %cst_13 : f32 to vector<8x512xf32>
    %20 = arith.select %18, %15, %19 : vector<8x512xi1>, vector<8x512xf32>
    %cst_14 = arith.constant dense<0.000000e+00> : vector<8xf32>
    %21 = vector.multi_reduction <add>, %20, %cst_14 [1] : vector<8x512xf32> to vector<8xf32>
    %22 = vector.shape_cast %21 : vector<8xf32> to vector<8x1xf32>
    %cst_15 = arith.constant dense<0.000000e+00> : vector<1xf32>
    %23 = vector.multi_reduction <add>, %22, %cst_15 [0] : vector<8x1xf32> to vector<1xf32>
    %24 = vector.shape_cast %23 : vector<1xf32> to vector<1x1xf32>
    %25 = arith.addf %16, %24 : vector<1x1xf32>
    %c0_16 = arith.constant 0 : index
    %c0_17 = arith.constant 0 : index
    %26 = vector.load %arg7[%c0_16, %c0_17] : memref<1x1xf32, #tpu.memory_space<vmem>>, vector<1x1xf32>
    tpu.vector_store %arg7[%c0_16, %c0_17], %25 {strides = array<i32>} : memref<1x1xf32, #tpu.memory_space<vmem>>, vector<1x1xf32>,
    %c0_18 = arith.constant 0 : index
    %c0_19 = arith.constant 0 : index
    %27 = vector.load %arg8[%c0_18, %c0_19] : memref<1x1xi32, #tpu.memory_space<vmem>>, vector<1x1xi32>
    %c0_i32_20 = arith.constant 0 : i32
    %28 = vector.broadcast %c0_i32_20 : i32 to vector<8x128xi32>
    %29 = arith.cmpi sgt, %3, %28 : vector<8x128xi32>
    %30 = arith.extui %29 : vector<8x128xi1> to vector<8x128xi32>
    %cst_21 = arith.constant dense<0> : vector<8xi32>
    %31 = vector.multi_reduction <add>, %30, %cst_21 [1] : vector<8x128xi32> to vector<8xi32>
    %32 = vector.shape_cast %31 : vector<8xi32> to vector<8x1xi32>
    %cst_22 = arith.constant dense<0> : vector<1xi32>
    %33 = vector.multi_reduction <add>, %32, %cst_22 [0] : vector<8x1xi32> to vector<1xi32>
    %34 = vector.shape_cast %33 : vector<1xi32> to vector<1x1xi32>
    %35 = arith.addi %27, %34 : vector<1x1xi32>
    %c0_23 = arith.constant 0 : index
    %c0_24 = arith.constant 0 : index
    %36 = vector.load %arg8[%c0_23, %c0_24] : memref<1x1xi32, #tpu.memory_space<vmem>>, vector<1x1xi32>
    tpu.vector_store %arg8[%c0_23, %c0_24], %35 {strides = array<i32>} : memref<1x1xi32, #tpu.memory_space<vmem>>, vector<1x1xi32>,
    %c0_25 = arith.constant 0 : index
    %c0_26 = arith.constant 0 : index
    %37 = vector.load %arg9[%c0_25, %c0_26] : memref<1x1xi32, #tpu.memory_space<vmem>>, vector<1x1xi32>
    %c0_i32_27 = arith.constant 0 : i32
    %38 = vector.broadcast %c0_i32_27 : i32 to vector<8x128xi32>
    %39 = arith.cmpi eq, %3, %38 : vector<8x128xi32>
    %40 = arith.extui %39 : vector<8x128xi1> to vector<8x128xi32>
    %cst_28 = arith.constant dense<0> : vector<8xi32>
    %41 = vector.multi_reduction <add>, %40, %cst_28 [1] : vector<8x128xi32> to vector<8xi32>
    %42 = vector.shape_cast %41 : vector<8xi32> to vector<8x1xi32>
    %cst_29 = arith.constant dense<0> : vector<1xi32>
    %43 = vector.multi_reduction <add>, %42, %cst_29 [0] : vector<8x1xi32> to vector<1xi32>
    %44 = vector.shape_cast %43 : vector<1xi32> to vector<1x1xi32>
    %45 = arith.addi %37, %44 : vector<1x1xi32>
    %c0_30 = arith.constant 0 : index
    %c0_31 = arith.constant 0 : index
    %46 = vector.load %arg9[%c0_30, %c0_31] : memref<1x1xi32, #tpu.memory_space<vmem>>, vector<1x1xi32>
    tpu.vector_store %arg9[%c0_30, %c0_31], %45 {strides = array<i32>} : memref<1x1xi32, #tpu.memory_space<vmem>>, vector<1x1xi32>,
    %c8_i32 = arith.constant 8 : i32
    %47 = arith.muli %arg0, %c8_i32 : i32
    %48 = tpu.assume_multiple %47, 8 : i32
    %cst_32 = arith.constant 0.000000e+00 : f32
    %49 = vector.broadcast %cst_32 : f32 to vector<8x512xf32>
    %50 = arith.cmpf oeq, %7, %49 : vector<8x512xf32>
    %51 = arith.andi %10, %50 : vector<8x512xi1>
    %cst_33 = arith.constant -1.000000e+00 : f32
    %52 = vector.broadcast %cst_33 : f32 to vector<8x512xf32>
    %53 = arith.select %51, %15, %52 : vector<8x512xi1>, vector<8x512xf32>
    %54 = arith.index_cast %48 : i32 to index
    %c0_34 = arith.constant 0 : index
    %55 = vector.load %arg6[%54, %c0_34] : memref<8x512xf32, #tpu.memory_space<vmem>>, vector<8x512xf32>
    tpu.vector_store %arg6[%54, %c0_34], %53 {strides = array<i32>} : memref<8x512xf32, #tpu.memory_space<vmem>>, vector<8x512xf32>,
    %c0_i32_35 = arith.constant 0 : i32
    %56 = arith.cmpi eq, %arg0, %c0_i32_35 : i32
    %57 = arith.extui %56 : i1 to i32
    %c0_i32_36 = arith.constant 0 : i32
    %58 = arith.cmpi ne, %57, %c0_i32_36 : i32
    scf.if %58 {
      %c0_37 = arith.constant 0 : index
      %c0_38 = arith.constant 0 : index
      %59 = vector.load %arg8[%c0_37, %c0_38] : memref<1x1xi32, #tpu.memory_space<vmem>>, vector<1x1xi32>
      %c0_39 = arith.constant 0 : index
      %c0_40 = arith.constant 0 : index
      %60 = vector.load %arg9[%c0_39, %c0_40] : memref<1x1xi32, #tpu.memory_space<vmem>>, vector<1x1xi32>
      %c1_i32 = arith.constant 1 : i32
      %61 = vector.broadcast %c1_i32 : i32 to vector<1x1xi32>
      %62 = arith.shrsi %59, %61 : vector<1x1xi32>
      %c2_i32 = arith.constant 2 : i32
      %63 = vector.broadcast %c2_i32 : i32 to vector<1x1xi32>
      %64 = arith.muli %63, %59 : vector<1x1xi32>
      %65 = arith.addi %64, %62 : vector<1x1xi32>
      %66 = arith.minsi %65, %60 : vector<1x1xi32>
      %c3_i32 = arith.constant 3 : i32
      %67 = vector.broadcast %c3_i32 : i32 to vector<1x1xi32>
      %68 = arith.muli %67, %59 : vector<1x1xi32>
      %69 = arith.addi %68, %62 : vector<1x1xi32>
      %70 = arith.sitofp %69 : vector<1x1xi32> to vector<1x1xf32>
      %c0_i32_41 = arith.constant 0 : i32
      %71 = vector.broadcast %c0_i32_41 : i32 to vector<1x1xi32>
      %c2139095041_i32 = arith.constant 2139095041 : i32
      %72 = vector.broadcast %c2139095041_i32 : i32 to vector<1x1xi32>
      %c0_i32_42 = arith.constant 0 : i32
      %c32_i32 = arith.constant 32 : i32
      %73 = arith.addi %c0_i32_42, %c32_i32 : i32
      %c1_i32_43 = arith.constant 1 : i32
      %74:2 = scf.for %arg10 = %c0_i32_42 to %73 step %c1_i32_43 iter_args(%arg11 = %71, %arg12 = %72) -> (vector<1x1xi32>, vector<1x1xi32>)  : i32 {
        %106 = arith.subi %arg12, %arg11 : vector<1x1xi32>
        %c1_i32_59 = arith.constant 1 : i32
        %107 = vector.broadcast %c1_i32_59 : i32 to vector<1x1xi32>
        %108 = arith.shrsi %106, %107 : vector<1x1xi32>
        %109 = arith.addi %arg11, %108 : vector<1x1xi32>
        %110 = tpu.bitcast %109 : vector<1x1xi32> -> vector<1x1xf32>
        %c0_60 = arith.constant 0 : index
        %c0_61 = arith.constant 0 : index
        %111 = vector.load %arg6[%c0_60, %c0_61] : memref<8x512xf32, #tpu.memory_space<vmem>>, vector<8x512xf32>
        %112 = vector.broadcast %110 : vector<1x1xf32> to vector<8x512xf32>
        %113 = arith.cmpf oge, %111, %112 : vector<8x512xf32>
        %114 = arith.extui %113 : vector<8x512xi1> to vector<8x512xi32>
        %cst_62 = arith.constant dense<0> : vector<8xi32>
        %115 = vector.multi_reduction <add>, %114, %cst_62 [1] : vector<8x512xi32> to vector<8xi32>
        %116 = vector.shape_cast %115 : vector<8xi32> to vector<8x1xi32>
        %cst_63 = arith.constant dense<0> : vector<1xi32>
        %117 = vector.multi_reduction <add>, %116, %cst_63 [0] : vector<8x1xi32> to vector<1xi32>
        %118 = vector.shape_cast %117 : vector<1xi32> to vector<1x1xi32>
        %119 = arith.cmpi sge, %118, %66 : vector<1x1xi32>
        %120 = arith.select %119, %109, %arg11 : vector<1x1xi1>, vector<1x1xi32>
        %121 = arith.select %119, %arg12, %109 : vector<1x1xi1>, vector<1x1xi32>
        scf.yield %120, %121 : vector<1x1xi32>, vector<1x1xi32>
      }
      %75 = tpu.bitcast %74#0 : vector<1x1xi32> -> vector<1x1xf32>
      %c0_44 = arith.constant 0 : index
      %c0_45 = arith.constant 0 : index
      %76 = vector.load %arg6[%c0_44, %c0_45] : memref<8x512xf32, #tpu.memory_space<vmem>>, vector<8x512xf32>
      %77 = vector.broadcast %75 : vector<1x1xf32> to vector<8x512xf32>
      %78 = arith.cmpf oge, %76, %77 : vector<8x512xf32>
      %79 = arith.extui %78 : vector<8x512xi1> to vector<8x512xi32>
      %cst_46 = arith.constant dense<0> : vector<8xi32>
      %80 = vector.multi_reduction <add>, %79, %cst_46 [1] : vector<8x512xi32> to vector<8xi32>
      %81 = vector.shape_cast %80 : vector<8xi32> to vector<8x1xi32>
      %cst_47 = arith.constant dense<0> : vector<1xi32>
      %82 = vector.multi_reduction <add>, %81, %cst_47 [0] : vector<8x1xi32> to vector<1xi32>
      %83 = vector.shape_cast %82 : vector<1xi32> to vector<1x1xi32>
      %cst_48 = arith.constant 0.000000e+00 : f32
      %84 = vector.broadcast %cst_48 : f32 to vector<8x512xf32>
      %85 = arith.select %78, %76, %84 : vector<8x512xi1>, vector<8x512xf32>
      %cst_49 = arith.constant dense<0.000000e+00> : vector<8xf32>
      %86 = vector.multi_reduction <add>, %85, %cst_49 [1] : vector<8x512xf32> to vector<8xf32>
      %87 = vector.shape_cast %86 : vector<8xf32> to vector<8x1xf32>
      %cst_50 = arith.constant dense<0.000000e+00> : vector<1xf32>
      %88 = vector.multi_reduction <add>, %87, %cst_50 [0] : vector<8x1xf32> to vector<1xf32>
      %89 = vector.shape_cast %88 : vector<1xf32> to vector<1x1xf32>
      %90 = arith.subi %83, %66 : vector<1x1xi32>
      %91 = arith.sitofp %90 : vector<1x1xi32> to vector<1x1xf32>
      %cst_51 = arith.constant 0.000000e+00 : f32
      %92 = vector.broadcast %cst_51 : f32 to vector<1x1xf32>
      %93 = arith.cmpf ogt, %91, %92 : vector<1x1xf32>
      %94 = arith.mulf %91, %75 : vector<1x1xf32>
      %cst_52 = arith.constant 0.000000e+00 : f32
      %95 = vector.broadcast %cst_52 : f32 to vector<1x1xf32>
      %96 = arith.select %93, %94, %95 : vector<1x1xi1>, vector<1x1xf32>
      %97 = arith.subf %89, %96 : vector<1x1xf32>
      %c0_i32_53 = arith.constant 0 : i32
      %98 = vector.broadcast %c0_i32_53 : i32 to vector<1x1xi32>
      %99 = arith.cmpi sgt, %66, %98 : vector<1x1xi32>
      %cst_54 = arith.constant 0.000000e+00 : f32
      %100 = vector.broadcast %cst_54 : f32 to vector<1x1xf32>
      %101 = arith.select %99, %97, %100 : vector<1x1xi1>, vector<1x1xf32>
      %c0_55 = arith.constant 0 : index
      %c0_56 = arith.constant 0 : index
      %102 = vector.load %arg7[%c0_55, %c0_56] : memref<1x1xf32, #tpu.memory_space<vmem>>, vector<1x1xf32>
      %103 = arith.addf %102, %101 : vector<1x1xf32>
      %104 = arith.divf %103, %70 : vector<1x1xf32>
      %c0_57 = arith.constant 0 : index
      %c0_58 = arith.constant 0 : index
      %105 = vector.load %arg5[%c0_57, %c0_58] : memref<1x1xf32, #tpu.memory_space<vmem>>, vector<1x1xf32>
      tpu.vector_store %arg5[%c0_57, %c0_58], %104 {strides = array<i32>} : memref<1x1xf32, #tpu.memory_space<vmem>>, vector<1x1xf32>,
    } else {
    }
    return
  }
  func.func @transform_0(%arg0: i32) -> (i32, i32) {
    %c0_i32 = arith.constant 0 : i32
    %c0_i32_0 = arith.constant 0 : i32
    %c0_i32_1 = arith.constant 0 : i32
    return %c0_i32, %c0_i32_0 : i32, i32
  }
  func.func @transform_1(%arg0: i32) -> (i32, i32) {
    %c0_i32 = arith.constant 0 : i32
    %c0_i32_0 = arith.constant 0 : i32
    %c0_i32_1 = arith.constant 0 : i32
    return %c0_i32, %c0_i32_0 : i32, i32
  }
  func.func @transform_2(%arg0: i32) -> (i32, i32) {
    %c0_i32 = arith.constant 0 : i32
    %c0_i32_0 = arith.constant 0 : i32
    return %arg0, %c0_i32 : i32, i32
  }
  func.func @transform_3(%arg0: i32) -> (i32, i32) {
    %c0_i32 = arith.constant 0 : i32
    %c0_i32_0 = arith.constant 0 : i32
    return %arg0, %c0_i32 : i32, i32
  }
  func.func @transform_4(%arg0: i32) -> (i32, i32) {
    %c0_i32 = arith.constant 0 : i32
    %c0_i32_0 = arith.constant 0 : i32
    %c0_i32_1 = arith.constant 0 : i32
    return %c0_i32, %c0_i32_0 : i32, i32
  }
}

</mosaic_0001>

<bundles_post_ra>
// kernel: multiclass_focal_loss.1
= control target key start
LH: loop header
LB: loop body
LE: loop exit
PB: predicated region body
PF: predicated region fallthrough
CT: control target
= control target key end

     0   :  { %9 = vsyncpa [#allocation7], 0  ;;  %vm22_vm0 = vcmask 0   ;;  %v680_v6 = vmov 0.0   ;;  %v681_v11 = vmov 0   ;;  %s964_s0 = inlined_call_operand.vmem [shape: f32[128,512], index: 0, kind: input, shape index: {}]   ;;  %s965_s1 = inlined_call_operand.vmem [shape: f32[1,512], index: 1, kind: input, shape index: {}]   ;;  %s966_s2 = inlined_call_operand.vmem [shape: f32[8,512], index: 2, kind: input, shape index: {}]   ;;  %s967_s3 = inlined_call_operand.vmem [shape: s32[8,128], index: 3, kind: input, shape index: {}]   ;;  %s968_s4 = inlined_call_operand.hbm [shape: f32[1,1], index: 4, kind: output, shape index: {}]  }
   0x1   :  { %v33_v0 = vld [vmem:[%s964_s0 + $0x8] sm:$0xff]  ;;  %v32_v3 = vld [vmem:[%s964_s0] sm:$0xff]  ;;  %v35_v5 = vld [vmem:[%s964_s0 + $0x18] sm:$0xff]  ;;  %23 = vst.msk [vmem:[#allocation3] sm:$0x1] %vm22_vm0, %v680_v6  ;;  %160 = vmatprep.mubr.f32.mxu0 %v680_v6  ;;  %231 = vmatprep.mubr.f32.mxu1 %v680_v6 }
   0x2   :  { %v37_v1 = vld [vmem:[%s964_s0 + $0x28] sm:$0xff]  ;;  %v36_v4 = vld [vmem:[%s964_s0 + $0x20] sm:$0xff]  ;;  %v39_v8 = vld [vmem:[%s964_s0 + $0x38] sm:$0xff]  ;;  %24 = vst.msk [vmem:[#allocation4] sm:$0x1] %vm22_vm0, %v681_v11 }
   0x3   :  { %v526_v2 = vpack.c.bf16 %v37_v1, %v33_v0  ;;  %v528_v7 = vpack.c.bf16 %v36_v4, %v32_v3  ;;  %v34_v9 = vld [vmem:[%s964_s0 + $0x10] sm:$0xff]  ;;  %25 = vst.msk [vmem:[#allocation5] sm:$0x1] %vm22_vm0, %v681_v11  ;;  %v558_v12 = vpack.c.bf16 %v39_v8, %v35_v5  ;;  %v41_v14 = vld [vmem:[%s964_s0 + $0x48] sm:$0xff]  ;;  %v40_v16 = vld [vmem:[%s964_s0 + $0x40] sm:$0xff] }
   0x4   :  { %v38_v10 = vld [vmem:[%s964_s0 + $0x30] sm:$0xff]  ;;  %v45_v15 = vld [vmem:[%s964_s0 + $0x68] sm:$0xff]  ;;  %v44_v18 = vld [vmem:[%s964_s0 + $0x60] sm:$0xff] }
   0x5   :  { %527 = vmatprep.subr.bf16.mxu0 %v526_v2  ;;  %v560_v13 = vpack.c.bf16 %v38_v10, %v34_v9  ;;  %v530_v17 = vpack.c.bf16 %v45_v15, %v41_v14  ;;  %v43_v19 = vld [vmem:[%s964_s0 + $0x58] sm:$0xff]  ;;  %559 = vmatprep.subr.bf16.mxu1 %v558_v12  ;;  %v532_v21 = vpack.c.bf16 %v44_v18, %v40_v16  ;;  %v42_v23 = vld [vmem:[%s964_s0 + $0x50] sm:$0xff]  ;;  %v49_v25 = vld [vmem:[%s964_s0 + $0x88] sm:$0xff] }
   0x6   :  { %529 = vmatpush1.bf16.msra.mxu0 %v528_v7  ;;  %v47_v20 = vld [vmem:[%s964_s0 + $0x78] sm:$0xff]  ;;  %v46_v24 = vld [vmem:[%s964_s0 + $0x70] sm:$0xff]  ;;  %v53_v27 = vld [vmem:[%s964_s0 + $0xa8] sm:$0xff] }
   0x7   :  { %v562_v22 = vpack.c.bf16 %v47_v20, %v43_v19  ;;  %561 = vmatpush1.bf16.msra.mxu1 %v560_v13  ;;  %531 = vmatprep.subr.bf16.mxu0 %v530_v17  ;;  %v564_v26 = vpack.c.bf16 %v46_v24, %v42_v23  ;;  %v48_v28 = vld [vmem:[%s964_s0 + $0x80] sm:$0xff]  ;;  %v534_v30 = vpack.c.bf16 %v53_v27, %v49_v25  ;;  %v51_v31 = vld [vmem:[%s964_s0 + $0x98] sm:$0xff]  ;;  %v50_v33 = vld [vmem:[%s964_s0 + $0x90] sm:$0xff] }
   0x8   :  { %v52_v29 = vld [vmem:[%s964_s0 + $0xa0] sm:$0xff]  ;;  %v55_v32 = vld [vmem:[%s964_s0 + $0xb8] sm:$0xff]  ;;  %v54_v36 = vld [vmem:[%s964_s0 + $0xb0] sm:$0xff] }
   0x9   :  { %563 = vmatprep.subr.bf16.mxu1 %v562_v22  ;;  %v536_v34 = vpack.c.bf16 %v52_v29, %v48_v28  ;;  %v566_v35 = vpack.c.bf16 %v55_v32, %v51_v31  ;;  %v57_v37 = vld [vmem:[%s964_s0 + $0xc8] sm:$0xff]  ;;  %v56_v40 = vld [vmem:[%s964_s0 + $0xc0] sm:$0xff]  ;;  %v59_v42 = vld [vmem:[%s964_s0 + $0xd8] sm:$0xff]  ;;  %v568_v43 = vpack.c.bf16 %v54_v36, %v50_v33 }
   0xa   :  { %533 = vmatpush1.bf16.msra.mxu0 %v532_v21  ;;  %v61_v38 = vld [vmem:[%s964_s0 + $0xe8] sm:$0xff]  ;;  %v60_v41 = vld [vmem:[%s964_s0 + $0xe0] sm:$0xff]  ;;  %v63_v44 = vld [vmem:[%s964_s0 + $0xf8] sm:$0xff] }
   0xb   :  { %535 = vmatprep.subr.bf16.mxu0 %v534_v30  ;;  %v538_v39 = vpack.c.bf16 %v61_v38, %v57_v37  ;;  %565 = vmatpush1.bf16.msra.mxu1 %v564_v26  ;;  %v58_v45 = vld [vmem:[%s964_s0 + $0xd0] sm:$0xff]  ;;  %v570_v46 = vpack.c.bf16 %v63_v44, %v59_v42  ;;  %v65_v48 = vld [vmem:[%s964_s0 + $0x108] sm:$0xff]  ;;  %v540_v50 = vpack.c.bf16 %v60_v41, %v56_v40  ;;  %v67_v51 = vld [vmem:[%s964_s0 + $0x118] sm:$0xff] }
   0xc   :  { %567 = vmatprep.subr.bf16.mxu1 %v566_v35  ;;  %v62_v47 = vld [vmem:[%s964_s0 + $0xf0] sm:$0xff]  ;;  %v69_v49 = vld [vmem:[%s964_s0 + $0x128] sm:$0xff]  ;;  %v71_v52 = vld [vmem:[%s964_s0 + $0x138] sm:$0xff] }
   0xd   :  { %v542_v53 = vpack.c.bf16 %v69_v49, %v65_v48  ;;  %v64_v54 = vld [vmem:[%s964_s0 + $0x100] sm:$0xff]  ;;  %v572_v56 = vpack.c.bf16 %v62_v47, %v58_v45  ;;  %v73_v57 = vld [vmem:[%s964_s0 + $0x148] sm:$0xff]  ;;  %v574_v59 = vpack.c.bf16 %v71_v52, %v67_v51  ;;  %v66_v60 = vld [vmem:[%s964_s0 + $0x110] sm:$0xff] }
   0xe   :  { %537 = vmatpush1.bf16.msra.mxu0 %v536_v34  ;;  %v68_v55 = vld [vmem:[%s964_s0 + $0x120] sm:$0xff]  ;;  %v77_v58 = vld [vmem:[%s964_s0 + $0x168] sm:$0xff]  ;;  %v70_v61 = vld [vmem:[%s964_s0 + $0x130] sm:$0xff] }
   0xf   :  { %539 = vmatprep.subr.bf16.mxu0 %v538_v39  ;;  %569 = vmatpush1.bf16.msra.mxu1 %v568_v43  ;;  %v544_v62 = vpack.c.bf16 %v68_v55, %v64_v54  ;;  %v75_v63 = vld [vmem:[%s964_s0 + $0x158] sm:$0xff]  ;;  %v546_v1 = vpack.c.bf16 %v77_v58, %v73_v57  ;;  %v72_v2 = vld [vmem:[%s964_s0 + $0x140] sm:$0xff]  ;;  %v576_v4 = vpack.c.bf16 %v70_v61, %v66_v60  ;;  %v81_v5 = vld [vmem:[%s964_s0 + $0x188] sm:$0xff] }
  0x10   :  { %571 = vmatprep.subr.bf16.mxu1 %v570_v46  ;;  %v79_v0 = vld [vmem:[%s964_s0 + $0x178] sm:$0xff]  ;;  %v76_v3 = vld [vmem:[%s964_s0 + $0x160] sm:$0xff]  ;;  %v85_v6 = vld [vmem:[%s964_s0 + $0x1a8] sm:$0xff] }
  0x11   :  { %v578_v7 = vpack.c.bf16 %v79_v0, %v75_v63  ;;  %v74_v8 = vld [vmem:[%s964_s0 + $0x150] sm:$0xff]  ;;  %v548_v10 = vpack.c.bf16 %v76_v3, %v72_v2  ;;  %v83_v12 = vld [vmem:[%s964_s0 + $0x198] sm:$0xff]  ;;  %v550_v14 = vpack.c.bf16 %v85_v6, %v81_v5  ;;  %v80_v15 = vld [vmem:[%s964_s0 + $0x180] sm:$0xff] }
  0x12   :  { %541 = vmatpush1.bf16.msra.mxu0 %v540_v50  ;;  %v78_v9 = vld [vmem:[%s964_s0 + $0x170] sm:$0xff]  ;;  %v87_v13 = vld [vmem:[%s964_s0 + $0x1b8] sm:$0xff]  ;;  %v84_v16 = vld [vmem:[%s964_s0 + $0x1a0] sm:$0xff] }
  0x13   :  { %543 = vmatprep.subr.bf16.mxu0 %v542_v53  ;;  %573 = vmatpush1.bf16.msra.mxu1 %v572_v56  ;;  %v26_v17 = vld [vmem:[%s967_s3] sm:$0xff]  ;;  %v580_v18 = vpack.c.bf16 %v78_v9, %v74_v8  ;;  %v89_v19 = vld [vmem:[%s964_s0 + $0x1c8] sm:$0xff]  ;;  %v582_v21 = vpack.c.bf16 %v87_v13, %v83_v12  ;;  %v82_v22 = vld [vmem:[%s964_s0 + $0x190] sm:$0xff]  ;;  %v552_v26 = vpack.c.bf16 %v84_v16, %v80_v15 }
  0x14   :  { %575 = vmatprep.subr.bf16.mxu1 %v574_v59  ;;  %v93_v20 = vld [vmem:[%s964_s0 + $0x1e8] sm:$0xff]  ;;  %vm304_vm1 = vcmp.gt.s32.totalorder %v26_v17, 0  ;;  %vm327_vm2 = vcmp.eq.s32.totalorder %v26_v17, 0  ;;  %v86_v23 = vld [vmem:[%s964_s0 + $0x1b0] sm:$0xff]  ;;  %v91_v27 = vld [vmem:[%s964_s0 + $0x1d8] sm:$0xff]  ;;  %v31_v46 = vcvt.s32.f32 %v26_v17 }
  0x15   :  { %v305_v24 = vsel %vm304_vm1, 1, %v681_v11  ;;  %v328_v25 = vsel %vm327_vm2, 1, %v681_v11  ;;  %v95_v28 = vld [vmem:[%s964_s0 + $0x1f8] sm:$0xff]  ;;  %v554_v32 = vpack.c.bf16 %v93_v20, %v89_v19  ;;  %v88_v33 = vld [vmem:[%s964_s0 + $0x1c0] sm:$0xff]  ;;  %v584_v36 = vpack.c.bf16 %v86_v23, %v82_v22  ;;  %v90_v40 = vld [vmem:[%s964_s0 + $0x1d0] sm:$0xff] }
  0x16   :  { %545 = vmatpush1.bf16.msra.mxu0 %v544_v62  ;;  %v307_v29 = vshrl.u32 %v305_v24, 16  ;;  %v330_v30 = vshrl.u32 %v328_v25, 16  ;;  %v306_v31 = vand.u32 65535, %v305_v24  ;;  %v92_v34 = vld [vmem:[%s964_s0 + $0x1e0] sm:$0xff]  ;;  %v329_v35 = vand.u32 65535, %v328_v25  ;;  %v94_v41 = vld [vmem:[%s964_s0 + $0x1f0] sm:$0xff] }
  0x17   :  { %547 = vmatprep.subr.bf16.mxu0 %v546_v1  ;;  %577 = vmatpush1.bf16.msra.mxu1 %v576_v4  ;;  %v586_v39 = vpack.c.bf16 %v95_v28, %v91_v27  ;;  %v556_v42 = vpack.c.bf16 %v92_v34, %v88_v33  ;;  %v588_v45 = vpack.c.bf16 %v94_v41, %v90_v40  ;;  %v303_v4 = vld [vmem:[#allocation4] sm:$0x1]  ;;  %v28_v22 = vld [vmem:[%s966_s2 + $0x8] sm:$0xff]  ;;  %v29_v23 = vld [vmem:[%s966_s2 + $0x10] sm:$0xff]  ;;  %v240_v25 = vlaneseq }
  0x18   :  { %579 = vmatprep.subr.bf16.mxu1 %v578_v7  ;;  %v309_v37 = vcvt.s32.f32 %v307_v29  ;;  %v332_v38 = vcvt.s32.f32 %v330_v30  ;;  %v308_v43 = vcvt.s32.f32 %v306_v31  ;;  %v331_v44 = vcvt.s32.f32 %v329_v35  ;;  %v326_v7 = vld [vmem:[#allocation5] sm:$0x1]  ;;  %v30_v24 = vld [vmem:[%s966_s2 + $0x18] sm:$0xff] }
  0x1a   :  { %549 = vmatpush1.bf16.msra.mxu0 %v548_v10  ;;  %312 = vadd.xlane.f32.xlu0 %v309_v37 }
  0x1b   :  { %551 = vmatprep.subr.bf16.mxu0 %v550_v14  ;;  %581 = vmatpush1.bf16.msra.mxu1 %v580_v18 }
  0x1c   :  { %583 = vmatprep.subr.bf16.mxu1 %v582_v21  ;;  %335 = vadd.xlane.f32.xlu1 %v332_v38  ;;  %v27_v21 = vld [vmem:[%s966_s2] sm:$0xff] }
  0x1d   :  { %622 = vlog2.f32 %v27_v21 }
  0x1e   :  { %553 = vmatpush1.bf16.msra.mxu0 %v552_v26  ;;  %310 = vadd.xlane.f32.xlu0 %v308_v43  ;;  %624 = vlog2.f32 %v28_v22  ;;  %v241_v26 = vshrl.u32 %v240_v25, 7 }
  0x1f   :  { %555 = vmatprep.subr.bf16.mxu0 %v554_v32  ;;  %585 = vmatpush1.bf16.msra.mxu1 %v584_v36  ;;  %626 = vlog2.f32 %v29_v23  ;;  %v238_v32 = vld [vmem:[%s965_s1] sm:$0xf]  ;;  %s934_s1 = smov 0  }
  0x20   :  { %587 = vmatprep.subr.bf16.mxu1 %v586_v39  ;;  %333 = vadd.xlane.f32.xlu1 %v331_v44  ;;  %628 = vlog2.f32 %v30_v24  ;;  %v242_v30 = vsub.s32 0, %v241_v26  ;;  %v246_v34 = vsub.s32 1, %v241_v26  ;;  %v250_v36 = vsub.s32 2, %v241_v26 }
  0x21   :  { %v254_v38 = vsub.s32 3, %v241_v26 }
  0x22   :  { %557 = vmatpush1.bf16.msra.mxu0 %v556_v42  ;;  %v243_v39 = vrot.slane %v238_v32, %v242_v30  ;;  %v247_v42 = vrot.slane %v238_v32, %v246_v34  ;;  %v251_v44 = vrot.slane %v238_v32, %v250_v36 }
  0x23   :  { %589 = vmatpush1.bf16.msra.mxu1 %v588_v45 }
  0x25   :  { %161 = vmatmul.mubr.f32.vlgmr.msra.gmra.mrb[0].mxu0 %v31_v46 }
  0x26   :  { %232 = vmatmul.mubr.f32.vlgmr.msra.gmra.mrb[0].mxu1 %v31_v46 }
  0x27   :  { %v623_v27 = vpop.eup %622 }
  0x28   :  { %v625_v28 = vpop.eup %624  ;;  %v265_v33 = vmul.f32 0.6931472, %v623_v27 }
  0x29   :  { %v627_v29 = vpop.eup %626  ;;  %v267_v35 = vmul.f32 0.6931472, %v625_v28 }
  0x2a   :  { %v629_v31 = vpop.eup %628  ;;  %v269_v37 = vmul.f32 0.6931472, %v627_v29  ;;  %v272_v41 = vsub.f32 0.0, %v265_v33 }
  0x2b   :  { %v271_v40 = vmul.f32 0.6931472, %v629_v31  ;;  %v273_v43 = vsub.f32 0.0, %v267_v35 }
  0x2c   :  { %v274_v46 = vsub.f32 0.0, %v269_v37 }
  0xa7   :  { %v313_v47 = vpop.xlane.xlu0 %312 }
  0xa8   :  { %v315_v48 = vcvt.f32.s32 %v313_v47  ;;  %v255_v47 = vrot.slane %v238_v32, %v254_v38 }
  0xa9   :  { %v336_v49 = vpop.xlane.xlu1 %335 }
  0xaa   :  { %v338_v50 = vcvt.f32.s32 %v336_v49  ;;  %v316_v51 = vshll.u32 %v315_v48, 16  ;;  %v275_v49 = vsub.f32 0.0, %v271_v40 }
  0xab   :  { %v311_v53 = vpop.xlane.xlu0 %310 }
  0xac   :  { %v339_v52 = vshll.u32 %v338_v50, 16  ;;  %v314_v54 = vcvt.f32.s32 %v311_v53 }
  0xad   :  { %v334_v55 = vpop.xlane.xlu1 %333 }
  0xae   :  { %v337_v56 = vcvt.f32.s32 %v334_v55  ;;  %v317_v57 = vadd.s32 %v316_v51, %v314_v54 }
  0xb0   :  { %v340_v58 = vadd.s32 %v339_v52, %v337_v56  ;;  %v318_v59 = vrot.slane %v317_v57, 4 }
  0xb2   :  { %v341_v60 = vrot.slane %v340_v58, 4  ;;  %v319_v61 = vadd.s32 %v318_v59, %v317_v57 }
  0xb4   :  { %v342_v62 = vadd.s32 %v341_v60, %v340_v58  ;;  %v320_v63 = vrot.slane %v319_v61, 2 }
  0xb6   :  { %v343_v0 = vrot.slane %v342_v62, 2  ;;  %v321_v1 = vadd.s32 %v320_v63, %v319_v61 }
  0xb8   :  { %v344_v2 = vadd.s32 %v343_v0, %v342_v62  ;;  %v322_v3 = vrot.slane %v321_v1, 1 }
  0xba   :  { %v345_v5 = vrot.slane %v344_v2, 1  ;;  %v323_v6 = vadd.s32 %v322_v3, %v321_v1 }
  0xbc   :  { %v346_v8 = vadd.s32 %v345_v5, %v344_v2  ;;  %v324_v9 = vadd.s32 %v323_v6, %v303_v4 }
  0xbe   :  { %v347_v10 = vadd.s32 %v346_v8, %v326_v7  ;;  %325 = vst.msk [vmem:[#allocation4] sm:$0x1] %vm22_vm0, %v324_v9  ;;  %v280_v9 = vld [vmem:[#allocation3] sm:$0x1] }
  0xc0   :  { %348 = vst.msk [vmem:[#allocation5] sm:$0x1] %vm22_vm0, %v347_v10 }
  0xc5   :  { %v374_v12 = vld [vmem:[#allocation4] sm:$0x1] }
  0xc6   :  { %v376_v13 = vshra.s32 %v374_v12, 1  ;;  %v377_v14 = vmul.u32 2, %v374_v12  ;;  %v381_v15 = vmul.u32 3, %v374_v12 }
  0xc7   :  { %v375_v16 = vld [vmem:[#allocation5] sm:$0x1] }
  0xc8   :  { %v913_v17 = vadd.s32 %v381_v15, %v376_v13  ;;  %v378_v18 = vadd.s32 %v377_v14, %v376_v13  ;;  %v668_v13 = vmov 2139095041   ;;  %v672_v14 = vmov 0  }
  0xca   :  { %v383_v19 = vcvt.s32.f32 %v913_v17  ;;  %vm379_vm3 = vcmp.lt.s32.totalorder %v378_v18, %v375_v16 }
  0xcb   :  { %v916_v20 = vsel %vm379_vm3, %v378_v18, %v375_v16 }
  0xf8   :  { %v162_v45 = vpop.f32.mrb[0].mxu0 }
  0xf9   :  { %vm260_vm4 = vcmp.eq.f32.partialorder %v162_v45, %v243_v39  ;;  %vm281_vm5 = vcmp.gt.f32.partialorder %v162_v45, 0.5  ;;  %vm350_vm6 = vcmp.eq.f32.partialorder %v162_v45, 0.0  ;;  %v164_v48 = vpop.f32.mrb[1].mxu0  ;;  %v233_v51 = vpop.f32.mrb[0].mxu1 }
  0xfa   :  { %v276_v50 = vsel %vm260_vm4, %v272_v41, 0.0  ;;  %vm354_vm7 = vmand %vm260_vm4, %vm350_vm6  ;;  %vm261_vm8 = vcmp.eq.f32.partialorder %v164_v48, %v247_v42  ;;  %vm282_vm9 = vcmp.gt.f32.partialorder %v164_v48, 0.5  ;;  %vm351_vm10 = vcmp.eq.f32.partialorder %v164_v48, 0.0  ;;  %v235_v55 = vpop.f32.mrb[1].mxu1 }
  0xfb   :  { %v285_v52 = vsel %vm281_vm5, %v276_v50, 0.0  ;;  %v358_v53 = vsel %vm354_vm7, %v276_v50, -1.0  ;;  %v277_v54 = vsel %vm261_vm8, %v273_v43, 0.0  ;;  %vm355_vm11 = vmand %vm261_vm8, %vm351_vm10  ;;  %vm262_vm12 = vcmp.eq.f32.partialorder %v233_v51, %v251_v44 }
  0xfc   :  { %367 = vst [vmem:[#allocation2] sm:$0xff] %v358_v53  ;;  %v286_v56 = vsel %vm282_vm9, %v277_v54, 0.0  ;;  %v359_v57 = vsel %vm355_vm11, %v277_v54, -1.0  ;;  %v278_v58 = vsel %vm262_vm12, %v274_v46, 0.0  ;;  %vm283_vm13 = vcmp.gt.f32.partialorder %v233_v51, 0.5 }
  0xfd   :  { %v289_v59 = vadd.f32 %v286_v56, %v285_v52  ;;  %368 = vst [vmem:[#allocation2 + $0x8] sm:$0xff] %v359_v57  ;;  %vm352_vm14 = vcmp.eq.f32.partialorder %v233_v51, 0.0  ;;  %vm263_vm15 = vcmp.eq.f32.partialorder %v235_v55, %v255_v47  ;;  %vm284_vm1 = vcmp.gt.f32.partialorder %v235_v55, 0.5 }
  0xfe   :  { %vm356_vm2 = vmand %vm262_vm12, %vm352_vm14  ;;  %v279_v60 = vsel %vm263_vm15, %v275_v49, 0.0  ;;  %vm353_vm3 = vcmp.eq.f32.partialorder %v235_v55, 0.0  ;;  %v287_v61 = vsel %vm283_vm13, %v278_v58, 0.0 }
  0xff   :  { %v360_v62 = vsel %vm356_vm2, %v278_v58, -1.0  ;;  %vm357_vm4 = vmand %vm263_vm15, %vm353_vm3  ;;  %v290_v63 = vadd.f32 %v289_v59, %v287_v61  ;;  %v288_v1 = vsel %vm284_vm1, %v279_v60, 0.0 }
 0x100   :  { %369 = vst [vmem:[#allocation2 + $0x10] sm:$0xff] %v360_v62  ;;  %v361_v0 = vsel %vm357_vm4, %v279_v60, -1.0 }
 0x101   :  { %370 = vst [vmem:[#allocation2 + $0x18] sm:$0xff] %v361_v0  ;;  %v291_v2 = vadd.f32 %v290_v63, %v288_v1 }
 0x103   :  { %292 = vadd.xlane.f32.xlu0 %v291_v2 }
 0x190   :  { %v293_v3 = vpop.xlane.xlu0 %292 }
 0x191   :  { %v294_v4 = vrot.slane %v293_v3, 4 }
 0x193   :  { %v295_v5 = vadd.f32 %v294_v4, %v293_v3 }
 0x195   :  { %v296_v6 = vrot.slane %v295_v5, 2 }
 0x197   :  { %v297_v7 = vadd.f32 %v296_v6, %v295_v5 }
 0x199   :  { %v298_v8 = vrot.slane %v297_v7, 1 }
 0x19b   :  { %v299_v10 = vadd.f32 %v298_v8, %v297_v7 }
 0x19d   :  { %v300_v12 = vadd.f32 %v299_v10, %v280_v9 }
 0x19f   :  { %302 = vst.msk [vmem:[#allocation3] sm:$0x1] %vm22_vm0, %v300_v12 }
 0x1a0 LB: > { %v392_v15 = vsub.s32 %v670_v13, %v674_v14  ;;  %v395_v21 = vld [vmem:[#allocation2] sm:$0xff]  ;;  %v396_v22 = vld [vmem:[#allocation2 + $0x8] sm:$0xff]  ;;  %v397_v23 = vld [vmem:[#allocation2 + $0x10] sm:$0xff]  ;;  %v682_v26 = vmov 0   ;;  %s389_s1 = sadd.s32 1, %s678_s1   ;;  %s678_s1 = sphi %s934_s1, %s389_s1   ;;  %v674_v14 = vphi %v672_v14, %v673_v14   ;;  %v670_v13 = vphi %v668_v13, %v433_v13  }
 0x1a1   : > { %v398_v24 = vld [vmem:[#allocation2 + $0x18] sm:$0xff]  ;;  %p386_p0 = scmp.ge.s32.totalorder %s389_s1, 32  }
 0x1a2   : > { %v393_v16 = vshra.s32 %v392_v15, 1  ;;  %v435_v51 = vld [vmem:[#allocation2] sm:$0xff] (%p386_p0)  ;;  %v436_v52 = vld [vmem:[#allocation2 + $0x8] sm:$0xff] (%p386_p0)  ;;  %v437_v53 = vld [vmem:[#allocation2 + $0x10] sm:$0xff] (%p386_p0)  ;;  %630 = vrcp.f32 (%p386_p0), %v383_v19  ;;  %vm492_vm15 = vcmp.gt.s32.totalorder (%p386_p0), %v916_v20, 0  ;;  %s683_s24 = smov (%p386_p0), [#allocation6]  }
 0x1a3   :  { %v438_v54 = vld [vmem:[#allocation2 + $0x18] sm:$0xff] (%p386_p0)  ;;  %s505_s25 = sshll.u32 (%p386_p0), %s683_s24, 4  ;;  %s506_s25 = int_to_ptr.vmem [resolvable:$true] %s505_s25 }
 0x1a4   : > { %v394_v18 = vadd.s32 %v674_v14, %v393_v16  ;;  %s632_s26 = scalar_lea.vmem (%p386_p0), %s506_s25, 16  ;;  %s636_s27 = scalar_lea.vmem (%p386_p0), %s506_s25, 32 }
 0x1a5   :  { %p633_p1 = scmp.ne.s32.totalorder (%p386_p0), %s506_s25, %s632_s26  ;;  %p637_p2 = scmp.lt.s32.totalorder (%p386_p0), %s506_s25, %s506_s25 }
 0x1a6   : > { %590 = vpush %v394_v18  ;;  %p638_p3 = scmp.lt.s32.totalorder (%p386_p0), %s636_s27, %s632_s26 }
 0x1a8   :  { %p639_p4 = por (%p386_p0), %p638_p3, %p637_p2 }
 0x1aa   :  { %p640_p5 = pnand (%p386_p0), %p639_p4, %p633_p1 }
 0x1d7   : > { %s591_s2 = spop %590 }
 0x1d8   : > { %v400_v25 = vstv %s591_s2 }
 0x1d9   : > { %vm402_vm5 = vcmp.ge.f32.partialorder %v395_v21, %v400_v25  ;;  %vm403_vm6 = vcmp.ge.f32.partialorder %v396_v22, %v400_v25  ;;  %vm404_vm7 = vcmp.ge.f32.partialorder %v397_v23, %v400_v25  ;;  %vm405_vm8 = vcmp.ge.f32.partialorder %v398_v24, %v400_v25 }
 0x1da   : > { %v406_v27 = vsel %vm402_vm5, 1, %v682_v26  ;;  %v407_v28 = vsel %vm403_vm6, 1, %v682_v26  ;;  %v408_v29 = vsel %vm404_vm7, 1, %v682_v26  ;;  %v409_v30 = vsel %vm405_vm8, 1, %v682_v26 }
 0x1db   : > { %v410_v31 = vadd.s32 %v407_v28, %v406_v27  ;;  %v411_v32 = vadd.s32 %v409_v30, %v408_v29 }
 0x1dd   : > { %v412_v33 = vadd.s32 %v411_v32, %v410_v31 }
 0x1df   : > { %v414_v34 = vshrl.u32 %v412_v33, 16  ;;  %v413_v36 = vand.u32 65535, %v412_v33 }
 0x1e1   : > { %v416_v35 = vcvt.s32.f32 %v414_v34  ;;  %v415_v37 = vcvt.s32.f32 %v413_v36 }
 0x1e3   : > { %419 = vadd.xlane.f32.xlu0 %v416_v35 }
 0x1e7   : > { %417 = vadd.xlane.f32.xlu0 %v415_v37  ;;  %v494_v37 = vld [vmem:[#allocation3] sm:$0x1] (%p386_p0) }
 0x270   : > { %v420_v38 = vpop.xlane.xlu0 %419 }
 0x271   : > { %v422_v39 = vcvt.f32.s32 %v420_v38  ;;  %v631_v38 = vpop.eup (%p386_p0), %630 }
 0x273   : > { %v423_v41 = vshll.u32 %v422_v39, 16 }
 0x274   : > { %v418_v40 = vpop.xlane.xlu0 %417 }
 0x275   : > { %v421_v42 = vcvt.f32.s32 %v418_v40 }
 0x277   : > { %v424_v43 = vadd.s32 %v423_v41, %v421_v42 }
 0x279   : > { %v425_v44 = vrot.slane %v424_v43, 4 }
 0x27b   : > { %v426_v45 = vadd.s32 %v425_v44, %v424_v43 }
 0x27d   : > { %v427_v46 = vrot.slane %v426_v45, 2 }
 0x27f   : > { %v428_v47 = vadd.s32 %v427_v46, %v426_v45 }
 0x281   : > { %v429_v48 = vrot.slane %v428_v47, 1  ;;  %388 = sbr.rel (!%p386_p0) target bundleno = 416 (0x1a0), region = 52 }
 0x283   : > { %v430_v49 = vadd.s32 %v429_v48, %v428_v47 }
 0x285   : > { %vm431_vm9 = vcmp.ge.s32.totalorder %v430_v49, %v916_v20 }
 0x286   : > { %v432_v50 = vsel %vm431_vm9, %v394_v18, %v674_v14   ;;  %v433_v13 = vsel %vm431_vm9, %v670_v13, %v394_v18  }
 0x287   : > { %v673_v14 = vmov %v432_v50   ;;  %592 = vpush (%p386_p0), %v432_v50 }
 0x2b8   :  { %s593_s23 = spop %592 }
 0x2b9   :  { %v440_v55 = vstv %s593_s23 }
 0x2ba   :  { %vm442_vm10 = vcmp.ge.f32.partialorder %v435_v51, %v440_v55  ;;  %vm443_vm11 = vcmp.ge.f32.partialorder %v436_v52, %v440_v55  ;;  %vm444_vm12 = vcmp.ge.f32.partialorder %v437_v53, %v440_v55  ;;  %vm445_vm13 = vcmp.ge.f32.partialorder %v438_v54, %v440_v55 }
 0x2bb   :  { %v446_v56 = vsel %vm442_vm10, 1, %v681_v11  ;;  %v447_v57 = vsel %vm443_vm11, 1, %v681_v11  ;;  %v448_v58 = vsel %vm444_vm12, 1, %v681_v11  ;;  %v471_v59 = vsel %vm442_vm10, %v435_v51, 0.0 }
 0x2bc   :  { %v472_v60 = vsel %vm443_vm11, %v436_v52, 0.0  ;;  %v449_v61 = vsel %vm445_vm13, 1, %v681_v11  ;;  %v450_v0 = vadd.s32 %v447_v57, %v446_v56  ;;  %v473_v1 = vsel %vm444_vm12, %v437_v53, 0.0 }
 0x2bd   :  { %v451_v62 = vadd.s32 %v449_v61, %v448_v58  ;;  %v475_v63 = vadd.f32 %v472_v60, %v471_v59  ;;  %v474_v4 = vsel %vm445_vm13, %v438_v54, 0.0 }
 0x2bf   :  { %v476_v2 = vadd.f32 %v475_v63, %v473_v1  ;;  %v452_v3 = vadd.s32 %v451_v62, %v450_v0 }
 0x2c1   :  { %v477_v5 = vadd.f32 %v476_v2, %v474_v4  ;;  %v454_v6 = vshrl.u32 %v452_v3, 16  ;;  %v453_v8 = vand.u32 65535, %v452_v3 }
 0x2c3   :  { %478 = vadd.xlane.f32.xlu1 %v477_v5  ;;  %v456_v7 = vcvt.s32.f32 %v454_v6  ;;  %v455_v9 = vcvt.s32.f32 %v453_v8 }
 0x2c5   :  { %459 = vadd.xlane.f32.xlu0 %v456_v7 }
 0x2c9   :  { %457 = vadd.xlane.f32.xlu0 %v455_v9 }
 0x350   :  { %v479_v13 = vpop.xlane.xlu1 %478 }
 0x351   :  { %v480_v16 = vrot.slane %v479_v13, 4 }
 0x352   :  { %v460_v10 = vpop.xlane.xlu0 %459 }
 0x353   :  { %v462_v12 = vcvt.f32.s32 %v460_v10  ;;  %v481_v22 = vadd.f32 %v480_v16, %v479_v13 }
 0x355   :  { %v463_v11 = vshll.u32 %v462_v12, 16  ;;  %v482_v25 = vrot.slane %v481_v22, 2 }
 0x356   :  { %v458_v14 = vpop.xlane.xlu0 %457 }
 0x357   :  { %v461_v15 = vcvt.f32.s32 %v458_v14  ;;  %v483_v28 = vadd.f32 %v482_v25, %v481_v22 }
 0x359   :  { %v464_v18 = vadd.s32 %v463_v11, %v461_v15  ;;  %v484_v31 = vrot.slane %v483_v28, 1 }
 0x35b   :  { %v465_v21 = vrot.slane %v464_v18, 4  ;;  %v485_v34 = vadd.f32 %v484_v31, %v483_v28 }
 0x35d   :  { %v466_v23 = vadd.s32 %v465_v21, %v464_v18 }
 0x35f   :  { %v467_v24 = vrot.slane %v466_v23, 2 }
 0x361   :  { %v468_v26 = vadd.s32 %v467_v24, %v466_v23 }
 0x363   :  { %v469_v27 = vrot.slane %v468_v26, 1 }
 0x365   :  { %v470_v29 = vadd.s32 %v469_v27, %v468_v26 }
 0x367   :  { %v486_v30 = vsub.s32 %v470_v29, %v916_v20 }
 0x369   :  { %v487_v32 = vcvt.s32.f32 %v486_v30 }
 0x36b   :  { %vm488_vm14 = vcmp.gt.f32.partialorder %v487_v32, 0.0  ;;  %v489_v33 = vmul.f32 %v487_v32, %v432_v50 }
 0x36d   :  { %v490_v35 = vsel %vm488_vm14, %v489_v33, 0.0 }
 0x36e   :  { %v491_v36 = vsub.f32 %v485_v34, %v490_v35 }
 0x370   :  { %v493_v39 = vsel %vm492_vm15, %v491_v36, 0.0 }
 0x371   :  { %v495_v40 = vadd.f32 %v494_v37, %v493_v39 }
 0x373   :  { %v497_v41 = vmul.f32 %v631_v38, %v495_v40 }
 0x375   :  { %498 = vst.msk [vmem:[#allocation6] sm:$0x1] %vm22_vm0, %v497_v41 }
 0x376   :  { %643 = shalt.err (!%p640_p5)
}
 0x377   :  { %s644_s29 = scalar_lea.hbm %s968_s4, 16 }
 0x378   :  { %p645_p6 = scmp.ne.s32.totalorder %s968_s4, %s644_s29  ;;  %p648_p7 = scmp.lt.u32.totalorder %s644_s29, %s968_s4 }
 0x37a   :  { %p650_p8 = pnand %p648_p7, %p645_p6 }
 0x37c   :  { %653 = shalt.err (!%p650_p8)
}
 0x37d   :  { %508 = dma.vmem_to_hbm [thread:$0]  %s506_s25, 16, %s968_s4, [#allocation7]  }
 0x37e   :  { %666 = dma.done.wait [#allocation7], 16  }
 0x37f   :  { %667 = vsyncadd [#allocation7], 4294967280 }
 0x380   :  { %512 = vsyncpa [#allocation7], 1 }

</bundles_post_ra>
